<compile_context>
chip_gen: v6e
topology: v6e:2x2x1
jax: 0.10.0
libtpu: 0.0.40
codegen_flags: <defaults>
</compile_context>

<pallas_src>
import math

import jax
import jax.numpy as jnp
from jax import lax
from jax.experimental import pallas as pl
from jax.experimental.pallas import tpu as pltpu


def _round_up(x, m):
    return ((x + m - 1) // m) * m


def _pick_tile(n, cap):
    """Largest tile <= cap dividing n (multiple of 8 when possible)."""
    if n <= cap:
        return n
    for t in range(cap, 7, -8):
        if n % t == 0:
            return t
    return math.gcd(n, cap)


# ---------------------------------------------------------------------------
# Kernel 1: QComplexDense
#   out_a = xa @ Wa^T + ba + j2 * (xb @ Wb^T)
#   out_b = xa @ Wb^T + bb + xb @ Wa^T
# Weights arrive pre-transposed ([E_in, E_out]) in bf16; j2 is a (1,1) scalar.
# ---------------------------------------------------------------------------
def _qc_dense_kernel(j2_ref, xa_ref, xb_ref, wa_ref, wb_ref, ba_ref, bb_ref,
                     oa_ref, ob_ref):
    j2 = j2_ref[...]                    # (1, 1) layer-level  -1 + sin(2*theta)
    xa = xa_ref[...]                    # bf16
    xb = xb_ref[...]
    wa = wa_ref[...]                    # bf16 (E_in, E_out)
    wb = wb_ref[...]

    # bf16 MXU operands, f32 accumulation.
    xbwb = jnp.dot(xb, wb, preferred_element_type=jnp.float32)
    out_a = (jnp.dot(xa, wa, preferred_element_type=jnp.float32)
             + j2 * xbwb + ba_ref[...])
    out_b = (jnp.dot(xa, wb, preferred_element_type=jnp.float32)
             + jnp.dot(xb, wa, preferred_element_type=jnp.float32)
             + bb_ref[...])

    oa_ref[...] = out_a.astype(oa_ref.dtype)
    ob_ref[...] = out_b.astype(ob_ref.dtype)


def qc_dense(xa, xb, wa, wb, ba, bb, j2, *, out_dtype=None, max_tile_rows=512):
    """xa/xb: [rows, E_in] ; wa/wb: [E_out, E_in] (torch layout) ; ba/bb: [E_out]."""
    rows, e_in = xa.shape
    e_out = wa.shape[0]
    out_dtype = xa.dtype if out_dtype is None else out_dtype

    xa = xa.astype(jnp.bfloat16)
    xb = xb.astype(jnp.bfloat16)
    wa_t = wa.T.astype(jnp.bfloat16)
    wb_t = wb.T.astype(jnp.bfloat16)
    ba2 = ba.reshape(1, e_out).astype(jnp.float32)
    bb2 = bb.reshape(1, e_out).astype(jnp.float32)
    j2_arr = jnp.reshape(j2, (1, 1)).astype(jnp.float32)

    # Balanced row tiling: rows just above the cap no longer pad up to ~2x.
    n_tiles = max(1, -(-rows // max_tile_rows))
    tm = _round_up(-(-rows // n_tiles), 8)
    rows_p = _round_up(rows, tm)
    if rows_p != rows:
        pad = ((0, rows_p - rows), (0, 0))
        xa = jnp.pad(xa, pad)
        xb = jnp.pad(xb, pad)

    flops = 8 * rows_p * e_in * e_out
    bytes_accessed = (2 * 2 * rows_p * e_in            # activations (bf16)
                      + 2 * 2 * e_in * e_out           # weights (bf16)
                      + 4 * 2 * e_out                  # biases (f32)
                      + 2 * 2 * rows_p * e_out)        # outputs

    out_a, out_b = pl.pallas_call(
        _qc_dense_kernel,
        out_shape=(jax.ShapeDtypeStruct((rows_p, e_out), out_dtype),
                   jax.ShapeDtypeStruct((rows_p, e_out), out_dtype)),
        grid_spec=pltpu.PrefetchScalarGridSpec(
            num_scalar_prefetch=0,
            grid=(rows_p // tm,),
            in_specs=[
                pl.BlockSpec((1, 1), lambda i: (0, 0)),          # j2 (scalar)
                pl.BlockSpec((tm, e_in), lambda i: (i, 0)),      # xa
                pl.BlockSpec((tm, e_in), lambda i: (i, 0)),      # xb
                pl.BlockSpec((e_in, e_out), lambda i: (0, 0)),   # Wa^T
                pl.BlockSpec((e_in, e_out), lambda i: (0, 0)),   # Wb^T
                pl.BlockSpec((1, e_out), lambda i: (0, 0)),      # ba
                pl.BlockSpec((1, e_out), lambda i: (0, 0)),      # bb
            ],
            out_specs=[
                pl.BlockSpec((tm, e_out), lambda i: (i, 0)),
                pl.BlockSpec((tm, e_out), lambda i: (i, 0)),
            ],
        ),
        compiler_params=pltpu.CompilerParams(
            dimension_semantics=("parallel",),
            # 64 MiB keeps headroom on v5e/v6e; re-derive (~48 MiB) for v7x.
            vmem_limit_bytes=64 * 1024 * 1024),
        cost_estimate=pl.CostEstimate(flops=flops, transcendentals=0,
                                      bytes_accessed=bytes_accessed),
    )(j2_arr, xa, xb, wa_t, wb_t, ba2, bb2)
    return out_a[:rows], out_b[:rows]


# ---------------------------------------------------------------------------
# Kernel 2: flash-style fused attention core (all heads per grid step).
# Grid = (batch, q-tile, kv-tile); online softmax over the kv-tile axis.
# ---------------------------------------------------------------------------
def _make_qc_attn_kernel(n_heads, head_dim, tk):
    e = n_heads * head_dim
    inv_sqrt_d = 1.0 / math.sqrt(head_dim)

    def rope(x, tab_ref):
        # x: (rows, E) f32 with (re, im) pairs interleaved along lanes.
        # tab_ref: (3, rows, E) = cos (repeated per pair), sinA (-sin on even
        # lanes), sinB (+sin on odd lanes); zeros kill the lane-roll wraparound.
        cos = tab_ref[0]
        sina = tab_ref[1]
        sinb = tab_ref[2]
        x_next = pltpu.roll(x, shift=e - 1, axis=1)   # x[:, (j+1) mod E]
        x_prev = pltpu.roll(x, shift=1, axis=1)       # x[:, (j-1) mod E]
        return x * cos + x_next * sina + x_prev * sinb

    def kernel(j2_ref, qa_ref, qb_ref, kva_ref, kvb_ref, bias_ref,
               ropeq_ref, ropek_ref, oa_ref, ob_ref,
               m_sc, l_sc, acc_sc, qr_sc):
        ki = pl.program_id(2)

        @pl.when(ki == 0)
        def _():
            m_sc[...] = jnp.full(m_sc.shape, -jnp.inf, dtype=m_sc.dtype)
            l_sc[...] = jnp.zeros(l_sc.shape, dtype=l_sc.dtype)
            acc_sc[...] = jnp.zeros(acc_sc.shape, dtype=acc_sc.dtype)
            # RoPE the resident Q tile once per (b, q-tile), reuse across kv tiles.
            qr_sc[0] = rope(qa_ref[0].astype(jnp.float32), ropeq_ref)
            qr_sc[1] = rope(qb_ref[0].astype(jnp.float32), ropeq_ref)

        kva = kva_ref[0]                       # (tk, 2E) bf16 : [k_a | v_a]
        kvb = kvb_ref[0]                       # (tk, 2E) bf16 : [k_b | v_b]
        ka = rope(kva[:, :e].astype(jnp.float32), ropek_ref)
        kb = rope(kvb[:, :e].astype(jnp.float32), ropek_ref)
        va = kva[:, e:]
        vb = kvb[:, e:]
        kb_j = kb * j2_ref[...]                # per-head j2 broadcast over lanes
        bias = bias_ref[0]                     # (tq, tk) additive mask (0 / -1e9)
        qa_r = qr_sc[0]
        qb_r = qr_sc[1]

        for h in range(n_heads):
            sl = slice(h * head_dim, (h + 1) * head_dim)
            # QC score algebra as one wide matmul (contraction depth 2*D):
            #   scores_a = [qa|qb] . [ka | j2*kb]^T ; scores_b = [qa|qb] . [kb | ka]^T
            q2 = jnp.concatenate([qa_r[:, sl], qb_r[:, sl]],
                                 axis=1).astype(jnp.bfloat16)            # (tq, 2D)
            k_sa = jnp.concatenate([ka[:, sl], kb_j[:, sl]], axis=1)     # (tk, 2D)
            k_sb = jnp.concatenate([kb[:, sl], ka[:, sl]], axis=1)       # (tk, 2D)
            k_all = jnp.concatenate([k_sa, k_sb],
                                    axis=0).astype(jnp.bfloat16)         # (2tk, 2D)
            s_all = jnp.einsum("qd,kd->qk", q2, k_all,
                               preferred_element_type=jnp.float32)       # (tq, 2tk)
            sa = s_all[:, :tk]
            sb = s_all[:, tk:]
            mag = jnp.sqrt(sa * sa + sb * sb + 1e-8) * inv_sqrt_d + bias

            # Online softmax update for head h.
            m_prev = m_sc[h]                                             # (tq, 1)
            m_new = jnp.maximum(m_prev, jnp.max(mag, axis=-1, keepdims=True))
            alpha = jnp.exp(m_prev - m_new)
            p = jnp.exp(mag - m_new)
            l_sc[h] = alpha * l_sc[h] + jnp.sum(p, axis=-1, keepdims=True)
            v2 = jnp.concatenate([va[:, sl], vb[:, sl]], axis=1)         # (tk, 2D)
            acc_sc[h] = alpha * acc_sc[h] + jnp.dot(
                p.astype(jnp.bfloat16), v2, preferred_element_type=jnp.float32)
            m_sc[h] = m_new

        @pl.when(ki == pl.num_programs(2) - 1)
        def _():
            outs_a, outs_b = [], []
            for h in range(n_heads):
                inv_l = pl.reciprocal(l_sc[h], approx=True)              # (tq, 1)
                o2 = acc_sc[h] * inv_l                                   # (tq, 2D)
                outs_a.append(o2[:, :head_dim])
                outs_b.append(o2[:, head_dim:])
            # Lane-dense full-E stores (no masked D=32 partial stores).
            oa_ref[0] = jnp.concatenate(outs_a, axis=1).astype(oa_ref.dtype)
            ob_ref[0] = jnp.concatenate(outs_b, axis=1).astype(ob_ref.dtype)

    return kernel


def qc_attention_core(qa, qb, kva, kvb, bias, j2_row, rope_tab, *, n_heads,
                      max_q_tile=256, max_kv_tile=256):
    """qa/qb: [B, Sq, E]; kva/kvb: [B, Skv, 2E] = [K|V]; bias: [B, Sq, Skv];
    j2_row: [1, E] per-head -1+sin(2*theta) repeated per lane; rope_tab: [3, S, E]."""
    b, sq, e = qa.shape
    skv = kva.shape[1]
    d = e // n_heads
    tq = _pick_tile(sq, max_q_tile)
    tk = _pick_tile(skv, max_kv_tile)
    assert sq % tq == 0 and skv % tk == 0
    nq = sq // tq
    nk = skv // tk
    out_dtype = jnp.bfloat16

    kernel = _make_qc_attn_kernel(n_heads, d, tk)

    flops = 12 * b * n_heads * sq * skv * d
    transcendentals = 2 * b * n_heads * sq * skv
    bytes_accessed = (2 * 2 * b * sq * e               # qa, qb (bf16)
                      + nq * 2 * 2 * b * skv * 2 * e   # kv_a, kv_b per q tile
                      + 4 * b * sq * skv               # additive mask (f32)
                      + 2 * 4 * 3 * sq * e             # rope tables
                      + 2 * 2 * b * sq * e)            # outputs (bf16)

    out_a, out_b = pl.pallas_call(
        kernel,
        out_shape=(jax.ShapeDtypeStruct((b, sq, e), out_dtype),
                   jax.ShapeDtypeStruct((b, sq, e), out_dtype)),
        grid_spec=pltpu.PrefetchScalarGridSpec(
            num_scalar_prefetch=0,
            grid=(b, nq, nk),
            in_specs=[
                pl.BlockSpec((1, e), lambda bi, qi, ki: (0, 0)),             # j2 row
                pl.BlockSpec((1, tq, e), lambda bi, qi, ki: (bi, qi, 0)),    # q_a
                pl.BlockSpec((1, tq, e), lambda bi, qi, ki: (bi, qi, 0)),    # q_b
                pl.BlockSpec((1, tk, 2 * e), lambda bi, qi, ki: (bi, ki, 0)),  # [k|v]_a
                pl.BlockSpec((1, tk, 2 * e), lambda bi, qi, ki: (bi, ki, 0)),  # [k|v]_b
                pl.BlockSpec((1, tq, tk), lambda bi, qi, ki: (bi, qi, ki)),  # mask bias
                pl.BlockSpec((3, tq, e), lambda bi, qi, ki: (0, qi, 0)),     # rope @ q rows
                pl.BlockSpec((3, tk, e), lambda bi, qi, ki: (0, ki, 0)),     # rope @ k rows
            ],
            out_specs=[
                pl.BlockSpec((1, tq, e), lambda bi, qi, ki: (bi, qi, 0)),
                pl.BlockSpec((1, tq, e), lambda bi, qi, ki: (bi, qi, 0)),
            ],
            scratch_shapes=[
                pltpu.VMEM((n_heads, tq, 1), jnp.float32),       # running max
                pltpu.VMEM((n_heads, tq, 1), jnp.float32),       # running sum
                pltpu.VMEM((n_heads, tq, 2 * d), jnp.float32),   # [out_a|out_b] acc
                pltpu.VMEM((2, tq, e), jnp.float32),             # RoPE'd q_a / q_b
            ],
        ),
        compiler_params=pltpu.CompilerParams(
            dimension_semantics=("parallel", "parallel", "arbitrary"),
            vmem_limit_bytes=64 * 1024 * 1024),
        cost_estimate=pl.CostEstimate(flops=flops,
                                      transcendentals=transcendentals,
                                      bytes_accessed=bytes_accessed),
    )(j2_row, qa, qb, kva, kvb, bias, rope_tab, rope_tab)

    return out_a, out_b


# ---------------------------------------------------------------------------
# RoPE tables (interleaved complex formulation).
# ---------------------------------------------------------------------------
def make_rope_tables(head_dim, seq_len):
    theta = 10000.0 ** (-2.0 * jnp.arange(0, head_dim, 2, dtype=jnp.float32)
                        / head_dim)                                # (D/2,)
    t = jnp.arange(seq_len, dtype=jnp.float32)                     # (S,)
    freqs = jnp.einsum("i,j->ij", t, theta)                        # (S, D/2)
    cos_h, sin_h = jnp.cos(freqs), jnp.sin(freqs)
    zeros = jnp.zeros_like(sin_h)
    cos_full = jnp.repeat(cos_h, 2, axis=-1)                       # (S, D)
    sin_a = jnp.stack([-sin_h, zeros], axis=-1).reshape(seq_len, head_dim)
    sin_b = jnp.stack([zeros, sin_h], axis=-1).reshape(seq_len, head_dim)
    freqs_cis = cos_h + 1j * sin_h                                 # (S, D/2)
    return cos_full, sin_a, sin_b, freqs_cis


# ---------------------------------------------------------------------------
# Full module forward (Pallas path). Heads live in the lane dim throughout —
# no [B,H,S,D] HBM transposes between the projection and attention kernels.
# ---------------------------------------------------------------------------
def qcomplex_attention_forward(params, x_q, x_kv, mask, layer_theta):
    """x_q / x_kv are (a, b) tuples of [B, S, E]; mask is [B, Sq, Skv] or None."""
    xq_a, xq_b = x_q
    xkv_a, xkv_b = x_kv
    b, sq, e = xq_a.shape
    skv = xkv_a.shape[1]
    h = params["n_heads"]
    d = e // h
    assert sq == skv, "fused kernel assumes equal q/kv sequence lengths"
    # TODO(synk): cross-attention with sq != skv needs separate q/k RoPE tables.

    j2_layer = -1.0 + jnp.sin(2.0 * layer_theta)

    def dense(p, xa, xb, out_dtype):
        rows = xa.shape[0] * xa.shape[1]
        oa, ob = qc_dense(xa.reshape(rows, xa.shape[2]),
                          xb.reshape(rows, xb.shape[2]),
                          p["wa"], p["wb"], p["ba"], p["bb"], j2_layer,
                          out_dtype=out_dtype)
        e_out = oa.shape[-1]
        return (oa.reshape(xa.shape[0], xa.shape[1], e_out),
                ob.reshape(xa.shape[0], xa.shape[1], e_out))

    # Q projection (bf16 intermediates, stays [B, S, E]).
    q_a, q_b = dense(params["q_proj"], xq_a, xq_b, jnp.bfloat16)

    # Fused K+V projection: weights stacked along E_out so x_kv is read once and
    # the output is already the [K | V] layout consumed by the attention kernel.
    pk, pv = params["k_proj"], params["v_proj"]
    kv_params = {"wa": jnp.concatenate([pk["wa"], pv["wa"]], axis=0),
                 "wb": jnp.concatenate([pk["wb"], pv["wb"]], axis=0),
                 "ba": jnp.concatenate([pk["ba"], pv["ba"]]),
                 "bb": jnp.concatenate([pk["bb"], pv["bb"]])}
    kv_a, kv_b = dense(kv_params, xkv_a, xkv_b, jnp.bfloat16)   # [B, Skv, 2E]

    # Per-position RoPE tables, tiled per head along the lane (E) dim.
    cos, sin_a, sin_b, _ = make_rope_tables(d, sq)
    rope_tab = jnp.stack([jnp.tile(cos, (1, h)),
                          jnp.tile(sin_a, (1, h)),
                          jnp.tile(sin_b, (1, h))], axis=0)      # (3, S, E)

    j2_head = -1.0 + jnp.sin(2.0 * params["thetas_head"])
    j2_row = jnp.repeat(j2_head, d).reshape(1, e).astype(jnp.float32)

    # Additive mask bias (0 keep / -1e9 masked).
    if mask is None:
        bias = jnp.zeros((b, sq, skv), jnp.float32)
    else:
        bias = jnp.where(mask == 0, -1e9, 0.0).astype(jnp.float32)

    att_a, att_b = qc_attention_core(q_a, q_b, kv_a, kv_b, bias, j2_row,
                                     rope_tab, n_heads=h)

    return dense(params["o_proj"], att_a, att_b, xq_a.dtype)


# ---------------------------------------------------------------------------
# Pure-JAX reference mirroring the PyTorch module (high-precision matmuls).
# ---------------------------------------------------------------------------
def _rope_ref(x, freqs_cis):
    xr = x.astype(jnp.float32).reshape(*x.shape[:-1], -1, 2)
    xc = lax.complex(xr[..., 0], xr[..., 1])
    rot = xc * freqs_cis
    out = jnp.stack([jnp.real(rot), jnp.imag(rot)], axis=-1)
    return out.reshape(x.shape)


def qcomplex_attention_reference(params, x_q, x_kv, mask, layer_theta):
    hp = lax.Precision.HIGHEST
    xq_a, xq_b = x_q
    xkv_a, xkv_b = x_kv
    b, sq, e = xq_a.shape
    h = params["n_heads"]
    dh = e // h
    j2 = -1.0 + jnp.sin(2.0 * layer_theta)

    def dense(name, xa, xb):
        p = params[name]
        oa = (jnp.einsum("bse,oe->bso", xa, p["wa"], precision=hp) + p["ba"]
              + jnp.einsum("bse,oe->bso", xb, p["wb"] * j2, precision=hp))
        ob = (jnp.einsum("bse,oe->bso", xa, p["wb"], precision=hp) + p["bb"]
              + jnp.einsum("bse,oe->bso", xb, p["wa"], precision=hp))
        return oa, ob

    def shape_heads(x):
        return x.reshape(b, -1, h, dh).transpose(0, 2, 1, 3)

    q_a, q_b = dense("q_proj", xq_a, xq_b)
    k_a, k_b = dense("k_proj", xkv_a, xkv_b)
    v_a, v_b = dense("v_proj", xkv_a, xkv_b)
    q_a, q_b, k_a, k_b, v_a, v_b = map(shape_heads,
                                       (q_a, q_b, k_a, k_b, v_a, v_b))

    _, _, _, freqs_cis = make_rope_tables(dh, sq)
    q_a, q_b = _rope_ref(q_a, freqs_cis), _rope_ref(q_b, freqs_cis)
    k_a, k_b = _rope_ref(k_a, freqs_cis), _rope_ref(k_b, freqs_cis)

    j2_head = (-1.0 + jnp.sin(2.0 * params["thetas_head"])).reshape(1, h, 1, 1)
    qk = lambda a, c: jnp.einsum("bhqd,bhkd->bhqk", a, c, precision=hp)
    scores_a = qk(q_a, k_a) + qk(q_b, k_b) * j2_head
    scores_b = qk(q_a, k_b) + qk(q_b, k_a)
    mag = jnp.sqrt(scores_a ** 2 + scores_b ** 2 + 1e-8) / math.sqrt(dh)
    if mask is not None:
        mag = jnp.where(mask[:, None, :, :] == 0, -1e9, mag)
    attn = jax.nn.softmax(mag, axis=-1)
    pv = lambda w, v: jnp.einsum("bhqk,bhkd->bhqd", w, v, precision=hp)
    oa = pv(attn, v_a)
    ob = pv(attn, v_b)
    unshape = lambda x: x.transpose(0, 2, 1, 3).reshape(b, -1, h * dh)
    return dense("o_proj", unshape(oa), unshape(ob))


def init_params(key, embed_dim, n_heads, initial_theta=0.3):
    bound = math.sqrt(6.0 / (embed_dim + embed_dim))   # xavier-uniform

    def dense_params(k):
        k1, k2, k3, k4 = jax.random.split(k, 4)
        return {
            "wa": jax.random.uniform(k1, (embed_dim, embed_dim), jnp.float32,
                                     -bound, bound),
            "wb": jax.random.uniform(k2, (embed_dim, embed_dim), jnp.float32,
                                     -bound, bound),
            "ba": 0.02 * jax.random.normal(k3, (embed_dim,), jnp.float32),
            "bb": 0.02 * jax.random.normal(k4, (embed_dim,), jnp.float32),
        }

    kq, kk, kv, ko, kt = jax.random.split(key, 5)
    return {
        "n_heads": n_heads,
        "q_proj": dense_params(kq),
        "k_proj": dense_params(kk),
        "v_proj": dense_params(kv),
        "o_proj": dense_params(ko),
        "thetas_head": initial_theta
                       + 0.1 * jax.random.normal(kt, (n_heads,), jnp.float32),
    }


if __name__ == "__main__":
    B, S, E, H = 2, 16, 128, 4       # batch, seq, embed_dim, n_heads (head_dim=32)

    key = jax.random.PRNGKey(0)
    kp, kqa, kqb, kka, kkb = jax.random.split(key, 5)
    params = init_params(kp, E, H, initial_theta=0.3)

    x_q = (jax.random.normal(kqa, (B, S, E), jnp.float32),
           jax.random.normal(kqb, (B, S, E), jnp.float32))
    x_kv = (jax.random.normal(kka, (B, S, E), jnp.float32),
            jax.random.normal(kkb, (B, S, E), jnp.float32))
    layer_theta = jnp.float32(0.7)
    mask = jnp.tile(jnp.tril(jnp.ones((S, S), jnp.float32))[None], (B, 1, 1))

    out_a, out_b = qcomplex_attention_forward(params, x_q, x_kv, mask,
                                              layer_theta)
    out_a, out_b = jax.block_until_ready((out_a, out_b))

    ref_a, ref_b = qcomplex_attention_reference(params, x_q, x_kv, mask,
                                                layer_theta)

    assert out_a.shape == (B, S, E) and out_b.shape == (B, S, E)
    assert out_a.dtype == x_q[0].dtype and out_b.dtype == x_q[0].dtype
    scale = max(1.0, float(jnp.maximum(jnp.max(jnp.abs(ref_a)),
                                       jnp.max(jnp.abs(ref_b)))))
    err_a = float(jnp.max(jnp.abs(out_a - ref_a)))
    err_b = float(jnp.max(jnp.abs(out_b - ref_b)))
    # bf16 MXU operands with f32 accumulation (per perf review) -> compare
    # relative to the output scale against the f32 HIGHEST-precision reference.
    assert err_a / scale < 5e-2 and err_b / scale < 5e-2, (err_a, err_b, scale)

    print("KERNEL_OK")
</pallas_src>

<mosaic_0001>
module attributes {stable_mosaic.version = 11 : i64} {
  func.func @_qc_dense_kernel(%arg0: i32, %arg1: memref<1x1xf32, #tpu.memory_space<vmem>>, %arg2: memref<32x128xbf16, #tpu.memory_space<vmem>>, %arg3: memref<32x128xbf16, #tpu.memory_space<vmem>>, %arg4: memref<128x128xbf16, #tpu.memory_space<vmem>>, %arg5: memref<128x128xbf16, #tpu.memory_space<vmem>>, %arg6: memref<1x128xf32, #tpu.memory_space<vmem>>, %arg7: memref<1x128xf32, #tpu.memory_space<vmem>>, %arg8: memref<32x128xbf16, #tpu.memory_space<vmem>>, %arg9: memref<32x128xbf16, #tpu.memory_space<vmem>>) attributes {dimension_semantics = [#tpu.dimension_semantics<parallel>], iteration_bounds = array<i64: 1>, scalar_prefetch = 0 : i64, scratch_operands = 0 : i64, tpu.core_type = #tpu.core_type<tc>, window_params = [{pipeline_mode = #tpu.pipeline_mode<synchronous>, transform_indices = @transform_0, window_bounds = array<i64: 1, 1>}, {transform_indices = @transform_1, window_bounds = array<i64: 32, 128>}, {transform_indices = @transform_2, window_bounds = array<i64: 32, 128>}, {pipeline_mode = #tpu.pipeline_mode<synchronous>, transform_indices = @transform_3, window_bounds = array<i64: 128, 128>}, {pipeline_mode = #tpu.pipeline_mode<synchronous>, transform_indices = @transform_4, window_bounds = array<i64: 128, 128>}, {pipeline_mode = #tpu.pipeline_mode<synchronous>, transform_indices = @transform_5, window_bounds = array<i64: 1, 128>}, {pipeline_mode = #tpu.pipeline_mode<synchronous>, transform_indices = @transform_6, window_bounds = array<i64: 1, 128>}, {transform_indices = @transform_7, window_bounds = array<i64: 32, 128>}, {transform_indices = @transform_8, window_bounds = array<i64: 32, 128>}]} {
    %c0 = arith.constant 0 : index
    %c0_0 = arith.constant 0 : index
    %0 = vector.load %arg1[%c0, %c0_0] : memref<1x1xf32, #tpu.memory_space<vmem>>, vector<1x1xf32>
    %c0_1 = arith.constant 0 : index
    %c0_2 = arith.constant 0 : index
    %1 = vector.load %arg2[%c0_1, %c0_2] : memref<32x128xbf16, #tpu.memory_space<vmem>>, vector<32x128xbf16>
    %c0_3 = arith.constant 0 : index
    %c0_4 = arith.constant 0 : index
    %2 = vector.load %arg3[%c0_3, %c0_4] : memref<32x128xbf16, #tpu.memory_space<vmem>>, vector<32x128xbf16>
    %c0_5 = arith.constant 0 : index
    %c0_6 = arith.constant 0 : index
    %3 = vector.load %arg4[%c0_5, %c0_6] : memref<128x128xbf16, #tpu.memory_space<vmem>>, vector<128x128xbf16>
    %c0_7 = arith.constant 0 : index
    %c0_8 = arith.constant 0 : index
    %4 = vector.load %arg5[%c0_7, %c0_8] : memref<128x128xbf16, #tpu.memory_space<vmem>>, vector<128x128xbf16>
    %cst = arith.constant dense<0.000000e+00> : vector<32x128xf32>
    %5 = tpu.matmul %2, %4, %cst {dimension_numbers = #tpu.dot_dimension_numbers<[1], [0], [0], [1], [0, 0, 1, 1], [], []>} : vector<32x128xbf16>, vector<128x128xbf16>, vector<32x128xf32> -> vector<32x128xf32>
    %cst_9 = arith.constant dense<0.000000e+00> : vector<32x128xf32>
    %6 = tpu.matmul %1, %3, %cst_9 {dimension_numbers = #tpu.dot_dimension_numbers<[1], [0], [0], [1], [0, 0, 1, 1], [], []>} : vector<32x128xbf16>, vector<128x128xbf16>, vector<32x128xf32> -> vector<32x128xf32>
    %7 = vector.broadcast %0 : vector<1x1xf32> to vector<32x128xf32>
    %8 = arith.mulf %7, %5 : vector<32x128xf32>
    %9 = arith.addf %6, %8 : vector<32x128xf32>
    %c0_10 = arith.constant 0 : index
    %c0_11 = arith.constant 0 : index
    %10 = vector.load %arg6[%c0_10, %c0_11] : memref<1x128xf32, #tpu.memory_space<vmem>>, vector<1x128xf32>
    %11 = vector.broadcast %10 : vector<1x128xf32> to vector<32x128xf32>
    %12 = arith.addf %9, %11 : vector<32x128xf32>
    %cst_12 = arith.constant dense<0.000000e+00> : vector<32x128xf32>
    %13 = tpu.matmul %1, %4, %cst_12 {dimension_numbers = #tpu.dot_dimension_numbers<[1], [0], [0], [1], [0, 0, 1, 1], [], []>} : vector<32x128xbf16>, vector<128x128xbf16>, vector<32x128xf32> -> vector<32x128xf32>
    %cst_13 = arith.constant dense<0.000000e+00> : vector<32x128xf32>
    %14 = tpu.matmul %2, %3, %cst_13 {dimension_numbers = #tpu.dot_dimension_numbers<[1], [0], [0], [1], [0, 0, 1, 1], [], []>} : vector<32x128xbf16>, vector<128x128xbf16>, vector<32x128xf32> -> vector<32x128xf32>
    %15 = arith.addf %13, %14 : vector<32x128xf32>
    %c0_14 = arith.constant 0 : index
    %c0_15 = arith.constant 0 : index
    %16 = vector.load %arg7[%c0_14, %c0_15] : memref<1x128xf32, #tpu.memory_space<vmem>>, vector<1x128xf32>
    %17 = vector.broadcast %16 : vector<1x128xf32> to vector<32x128xf32>
    %18 = arith.addf %15, %17 : vector<32x128xf32>
    %19 = arith.truncf %12 : vector<32x128xf32> to vector<32x128xbf16>
    %c0_16 = arith.constant 0 : index
    %c0_17 = arith.constant 0 : index
    %20 = vector.load %arg8[%c0_16, %c0_17] : memref<32x128xbf16, #tpu.memory_space<vmem>>, vector<32x128xbf16>
    tpu.vector_store %arg8[%c0_16, %c0_17], %19 {strides = array<i32>} : memref<32x128xbf16, #tpu.memory_space<vmem>>, vector<32x128xbf16>,
    %21 = arith.truncf %18 : vector<32x128xf32> to vector<32x128xbf16>
    %c0_18 = arith.constant 0 : index
    %c0_19 = arith.constant 0 : index
    %22 = vector.load %arg9[%c0_18, %c0_19] : memref<32x128xbf16, #tpu.memory_space<vmem>>, vector<32x128xbf16>
    tpu.vector_store %arg9[%c0_18, %c0_19], %21 {strides = array<i32>} : memref<32x128xbf16, #tpu.memory_space<vmem>>, vector<32x128xbf16>,
    return
  }
  func.func @transform_0(%arg0: i32) -> (i32, i32) {
    %c0_i32 = arith.constant 0 : i32
    %c0_i32_0 = arith.constant 0 : i32
    %c0_i32_1 = arith.constant 0 : i32
    return %c0_i32, %c0_i32_0 : i32, i32
  }
  func.func @transform_1(%arg0: i32) -> (i32, i32) {
    %c0_i32 = arith.constant 0 : i32
    %c0_i32_0 = arith.constant 0 : i32
    return %arg0, %c0_i32 : i32, i32
  }
  func.func @transform_2(%arg0: i32) -> (i32, i32) {
    %c0_i32 = arith.constant 0 : i32
    %c0_i32_0 = arith.constant 0 : i32
    return %arg0, %c0_i32 : i32, i32
  }
  func.func @transform_3(%arg0: i32) -> (i32, i32) {
    %c0_i32 = arith.constant 0 : i32
    %c0_i32_0 = arith.constant 0 : i32
    %c0_i32_1 = arith.constant 0 : i32
    return %c0_i32, %c0_i32_0 : i32, i32
  }
  func.func @transform_4(%arg0: i32) -> (i32, i32) {
    %c0_i32 = arith.constant 0 : i32
    %c0_i32_0 = arith.constant 0 : i32
    %c0_i32_1 = arith.constant 0 : i32
    return %c0_i32, %c0_i32_0 : i32, i32
  }
  func.func @transform_5(%arg0: i32) -> (i32, i32) {
    %c0_i32 = arith.constant 0 : i32
    %c0_i32_0 = arith.constant 0 : i32
    %c0_i32_1 = arith.constant 0 : i32
    return %c0_i32, %c0_i32_0 : i32, i32
  }
  func.func @transform_6(%arg0: i32) -> (i32, i32) {
    %c0_i32 = arith.constant 0 : i32
    %c0_i32_0 = arith.constant 0 : i32
    %c0_i32_1 = arith.constant 0 : i32
    return %c0_i32, %c0_i32_0 : i32, i32
  }
  func.func @transform_7(%arg0: i32) -> (i32, i32) {
    %c0_i32 = arith.constant 0 : i32
    %c0_i32_0 = arith.constant 0 : i32
    return %arg0, %c0_i32 : i32, i32
  }
  func.func @transform_8(%arg0: i32) -> (i32, i32) {
    %c0_i32 = arith.constant 0 : i32
    %c0_i32_0 = arith.constant 0 : i32
    return %arg0, %c0_i32 : i32, i32
  }
}

</mosaic_0001>

<bundles_post_ra>
// kernel: tpu_custom_call.1
= control target key start
LH: loop header
LB: loop body
LE: loop exit
PB: predicated region body
PF: predicated region fallthrough
CT: control target
= control target key end

     0   :  { %s1001_s0 = inlined_call_operand.<no memory space> [shape: f32[1,1], index: 0, kind: input, shape index: {}]   ;;  %s1002_s1 = inlined_call_operand.hbm [shape: bf16[32,128], index: 1, kind: input, shape index: {}]   ;;  %s1003_s2 = inlined_call_operand.hbm [shape: bf16[32,128], index: 2, kind: input, shape index: {}]   ;;  %s1004_s3 = inlined_call_operand.hbm [shape: bf16[128,128], index: 3, kind: input, shape index: {}]   ;;  %s1005_s4 = inlined_call_operand.hbm [shape: bf16[128,128], index: 4, kind: input, shape index: {}]   ;;  %s1006_s5 = inlined_call_operand.vmem [shape: f32[1,128], index: 5, kind: input, shape index: {}]   ;;  %s1007_s6 = inlined_call_operand.vmem [shape: f32[1,128], index: 6, kind: input, shape index: {}]   ;;  %s1008_s7 = inlined_call_operand.hbm [shape: bf16[32,128], index: 7, kind: output, shape index: {0}]   ;;  %s1009_s8 = inlined_call_operand.hbm [shape: bf16[32,128], index: 8, kind: output, shape index: {1}]  }
   0x1   :  { %v14_v0 = vstv %s1001_s0 }
   0x2   :  { %15 = vst [vmem:[#allocation2] sm:$0x1] %v14_v0 }
   0x3   :  { %16 = vsyncpa [#allocation4], 0 }
   0x4   :  { %17 = vsyncpa [#allocation7], 0 }
   0x5   :  { %18 = vsyncpa [#allocation10], 0 }
   0x6   :  { %19 = vsyncpa [#allocation5], 0 }
   0x7   :  { %20 = vsyncpa [#allocation13], 0  ;;  %s896_s29 = smov [#allocation6]   ;;  %s897_s9 = smov [#allocation3]  }
   0x8   :  { %s40_s30 = sshll.u32 %s896_s29, 4  ;;  %s28_s10 = sshll.u32 %s897_s9, 4  ;;  %s41_s30 = int_to_ptr.vmem [resolvable:$true] %s40_s30  ;;  %s29_s10 = int_to_ptr.vmem [resolvable:$true] %s28_s10 }
   0x9   :  { %s774_s11 = scalar_lea.vmem %s41_s30, 256  ;;  %p779_p1 = scmp.lt.s32.totalorder %s41_s30, %s41_s30 }
   0xa   :  { %p775_p0 = scmp.ne.s32.totalorder %s41_s30, %s774_s11  ;;  %p780_p2 = scmp.lt.s32.totalorder %s774_s11, %s774_s11 }
   0xc   :  { %p781_p3 = por %p780_p2, %p779_p1 }
   0xe   :  { %p782_p4 = pnand %p781_p3, %p775_p0 }
  0x10   :  { %785 = shalt.err (!%p782_p4)
}
  0x11   :  { %s898_s0 = smov 64   ;;  %s899_s12 = smov 4  }
  0x12   :  { %46 = dma.hbm_to_vmem [thread:$0]  %s1003_s2, 256, %s41_s30, [#allocation7], %s898_s0, %s898_s0, %s899_s12  }
  0x13   :  { %s794_s15 = scalar_lea.vmem %s29_s10, 256  ;;  %p799_p6 = scmp.lt.s32.totalorder %s29_s10, %s29_s10 }
  0x14   :  { %p795_p5 = scmp.ne.s32.totalorder %s29_s10, %s794_s15  ;;  %p800_p7 = scmp.lt.s32.totalorder %s794_s15, %s794_s15 }
  0x16   :  { %p801_p8 = por %p800_p7, %p799_p6 }
  0x18   :  { %p802_p9 = pnand %p801_p8, %p795_p5 }
  0x1a   :  { %805 = shalt.err (!%p802_p9)
}
  0x1b   :  { %34 = dma.hbm_to_vmem [thread:$0]  %s1002_s1, 256, %s29_s10, [#allocation4], %s898_s0, %s898_s0, %s899_s12  }
  0x1c   :  { %s900_s18 = smov [#allocation8]   ;;  %s901_s20 = smov [#allocation9]  }
  0x1d   :  { %s52_s19 = sshll.u32 %s900_s18, 4  ;;  %s64_s21 = sshll.u32 %s901_s20, 4  ;;  %s53_s19 = int_to_ptr.vmem [resolvable:$true] %s52_s19  ;;  %s65_s21 = int_to_ptr.vmem [resolvable:$true] %s64_s21 }
  0x1e   :  { %s814_s2 = scalar_lea.vmem %s53_s19, 1024  ;;  %p819_p11 = scmp.lt.s32.totalorder %s53_s19, %s53_s19 }
  0x1f   :  { %p815_p10 = scmp.ne.s32.totalorder %s53_s19, %s814_s2  ;;  %p820_p12 = scmp.lt.s32.totalorder %s814_s2, %s814_s2 }
  0x21   :  { %p821_p13 = por %p820_p12, %p819_p11 }
  0x23   :  { %p822_p0 = pnand %p821_p13, %p815_p10 }
  0x25   :  { %825 = shalt.err (!%p822_p0)
}
  0x26   :  { %58 = dma.hbm_to_vmem [thread:$0]  %s1004_s3, 1024, %s53_s19, [#allocation7], %s898_s0, %s898_s0, %s899_s12  }
  0x27   :  { %s834_s1 = scalar_lea.vmem %s65_s21, 1024  ;;  %p839_p2 = scmp.lt.s32.totalorder %s65_s21, %s65_s21 }
  0x28   :  { %p835_p1 = scmp.ne.s32.totalorder %s65_s21, %s834_s1  ;;  %p840_p3 = scmp.lt.s32.totalorder %s834_s1, %s834_s1 }
  0x2a   :  { %p841_p4 = por %p840_p3, %p839_p2 }
  0x2c   :  { %p842_p5 = pnand %p841_p4, %p835_p1 }
  0x2e   :  { %845 = shalt.err (!%p842_p5)
}
  0x2f   :  { %70 = dma.hbm_to_vmem [thread:$0]  %s1005_s4, 1024, %s65_s21, [#allocation10], %s898_s0, %s898_s0, %s899_s12  }
  0x30   :  { %886 = dma.done.wait [#allocation4], 256  }
  0x31   :  { %887 = vsyncadd [#allocation4], 4294967040 }
  0x32   :  { %888 = dma.done.wait [#allocation7], 1280  }
  0x33   :  { %889 = vsyncadd [#allocation7], 4294966016 }
  0x34   :  { %890 = dma.done.wait [#allocation10], 1024  }
  0x35   :  { %891 = vsyncadd [#allocation10], 4294966272  ;;  %v902_v1 = vmov 0   ;;  %v746_v2 = vld [vmem:[#allocation9 + $0x38] sm:$0xff]   ;;  %v977_v4 = vld [vmem:[#allocation9 + $0x30] sm:$0xff]   ;;  %s903_s26 = smov [#allocation11]  }
  0x36   :  { %745 = vset.pattern.permute.xlu0 %v902_v1  ;;  %v747_v3 = vld [vmem:[#allocation8 + $0x38] sm:$0xff]   ;;  %656 = vmatprep.subr.bf16.mxu0 %v746_v2  ;;  %v749_v5 = vld [vmem:[#allocation8 + $0x30] sm:$0xff]   ;;  %v750_v6 = vld [vmem:[#allocation9 + $0x28] sm:$0xff]   ;;  %s525_s27 = sshll.u32 %s903_s26, 4  ;;  %s526_s27 = int_to_ptr.vmem [resolvable:$true] %s525_s27 }
  0x37   :  { %676 = vmatprep.subr.bf16.mxu1 %v747_v3  ;;  %657 = vmatpush3.bf16.msra.mxu0 %v746_v2  ;;  %v751_v7 = vld [vmem:[#allocation8 + $0x28] sm:$0xff]   ;;  %v752_v8 = vld [vmem:[#allocation9 + $0x20] sm:$0xff]   ;;  %v754_v10 = vld [vmem:[#allocation9 + $0x18] sm:$0xff]   ;;  %s846_s28 = scalar_lea.vmem %s526_s27, 256  ;;  %p851_p7 = scmp.lt.s32.totalorder %s526_s27, %s526_s27 }
  0x38   :  { %677 = vmatpush3.bf16.msra.mxu1 %v747_v3  ;;  %658 = vmatprep.subr.bf16.mxu0 %v977_v4  ;;  %v753_v9 = vld [vmem:[#allocation8 + $0x20] sm:$0xff]   ;;  %v755_v11 = vld [vmem:[#allocation8 + $0x18] sm:$0xff]   ;;  %v756_v12 = vld [vmem:[#allocation9 + $0x10] sm:$0xff]   ;;  %p847_p6 = scmp.ne.s32.totalorder %s526_s27, %s846_s28  ;;  %p852_p8 = scmp.lt.s32.totalorder %s846_s28, %s846_s28 }
  0x39   :  { %678 = vmatprep.subr.bf16.mxu1 %v749_v5  ;;  %v757_v13 = vld [vmem:[#allocation8 + $0x10] sm:$0xff]   ;;  %v763_v15 = vld [vmem:[#allocation3] sm:$0xff]   ;;  %v758_v16 = vld [vmem:[#allocation9 + $0x8] sm:$0xff]  }
  0x3a   :  { %v762_v14 = vld [vmem:[#allocation6] sm:$0xff]   ;;  %692 = vmatprep.mubr.bf16.mxu1 %v763_v15  ;;  %v565_v17 = vld [vmem:[#allocation2] ss:$0 sm:$0xff]  ;;  %v759_v18 = vld [vmem:[#allocation8 + $0x8] sm:$0xff]   ;;  %p853_p9 = por %p852_p8, %p851_p7 }
  0x3b   :  { %659 = vmatpush3.bf16.msra.mxu0 %v977_v4  ;;  %672 = vmatprep.mubr.bf16.mxu0 %v762_v14  ;;  %v760_v19 = vld [vmem:[#allocation9] sm:$0xff]   ;;  %v764_v21 = vld [vmem:[#allocation6 + $0x8] sm:$0xff]   ;;  %v765_v22 = vld [vmem:[#allocation3 + $0x8] sm:$0xff]  }
  0x3c   :  { %679 = vmatpush3.bf16.msra.mxu1 %v749_v5  ;;  %660 = vmatprep.subr.bf16.mxu0 %v750_v6  ;;  %v761_v20 = vld [vmem:[#allocation8] sm:$0xff]   ;;  %v576_v34 = vld [vmem:[%s1006_s5] ss:$0 sm:$0xff]  ;;  %p854_p10 = pnand %p853_p9, %p847_p6 }
  0x3d   :  { %680 = vmatprep.subr.bf16.mxu1 %v751_v7  ;;  %244 = vperm.xlu0 %745, %v565_v17  }
  0x3f   :  { %661 = vmatpush3.bf16.msra.mxu0 %v750_v6 }
  0x40   :  { %681 = vmatpush3.bf16.msra.mxu1 %v751_v7  ;;  %662 = vmatprep.subr.bf16.mxu0 %v752_v8 }
  0x41   :  { %682 = vmatprep.subr.bf16.mxu1 %v753_v9 }
  0x43   :  { %663 = vmatpush3.bf16.msra.mxu0 %v752_v8 }
  0x44   :  { %683 = vmatpush3.bf16.msra.mxu1 %v753_v9  ;;  %664 = vmatprep.subr.bf16.mxu0 %v754_v10 }
  0x45   :  { %684 = vmatprep.subr.bf16.mxu1 %v755_v11 }
  0x47   :  { %665 = vmatpush3.bf16.msra.mxu0 %v754_v10 }
  0x48   :  { %685 = vmatpush3.bf16.msra.mxu1 %v755_v11  ;;  %666 = vmatprep.subr.bf16.mxu0 %v756_v12 }
  0x49   :  { %686 = vmatprep.subr.bf16.mxu1 %v757_v13 }
  0x4b   :  { %667 = vmatpush3.bf16.msra.mxu0 %v756_v12 }
  0x4c   :  { %687 = vmatpush3.bf16.msra.mxu1 %v757_v13  ;;  %668 = vmatprep.subr.bf16.mxu0 %v758_v16 }
  0x4d   :  { %688 = vmatprep.subr.bf16.mxu1 %v759_v18 }
  0x4f   :  { %669 = vmatpush3.bf16.msra.mxu0 %v758_v16 }
  0x50   :  { %689 = vmatpush3.bf16.msra.mxu1 %v759_v18  ;;  %670 = vmatprep.subr.bf16.mxu0 %v760_v19 }
  0x51   :  { %690 = vmatprep.subr.bf16.mxu1 %v761_v20 }
  0x53   :  { %671 = vmatpush3.bf16.msra.mxu0 %v760_v19 }
  0x54   :  { %691 = vmatpush3.bf16.msra.mxu1 %v761_v20  ;;  %696 = vmatprep.subr.bf16.mxu0 %v747_v3 }
  0x55   :  { %716 = vmatprep.subr.bf16.mxu1 %v746_v2 }
  0x56   :  { %673 = vmatmul.mubr.bf16.vlgmr.msra.gmra.mxu0 %v764_v21 }
  0x57   :  { %693 = vmatmul.mubr.bf16.vlgmr.msra.gmra.mxu1 %v765_v22  ;;  %697 = vmatpush3.bf16.msra.mxu0 %v747_v3 }
  0x58   :  { %717 = vmatpush3.bf16.msra.mxu1 %v746_v2  ;;  %698 = vmatprep.subr.bf16.mxu0 %v749_v5 }
  0x59   :  { %718 = vmatprep.subr.bf16.mxu1 %v977_v4  ;;  %712 = vmatprep.mubr.bf16.mxu0 %v762_v14 }
  0x5a   :  { %732 = vmatprep.mubr.bf16.mxu1 %v763_v15 }
  0x5b   :  { %699 = vmatpush3.bf16.msra.mxu0 %v749_v5 }
  0x5c   :  { %719 = vmatpush3.bf16.msra.mxu1 %v977_v4  ;;  %700 = vmatprep.subr.bf16.mxu0 %v751_v7 }
  0x5d   :  { %720 = vmatprep.subr.bf16.mxu1 %v750_v6 }
  0x5f   :  { %701 = vmatpush3.bf16.msra.mxu0 %v751_v7 }
  0x60   :  { %721 = vmatpush3.bf16.msra.mxu1 %v750_v6  ;;  %702 = vmatprep.subr.bf16.mxu0 %v753_v9 }
  0x61   :  { %722 = vmatprep.subr.bf16.mxu1 %v752_v8 }
  0x63   :  { %703 = vmatpush3.bf16.msra.mxu0 %v753_v9 }
  0x64   :  { %723 = vmatpush3.bf16.msra.mxu1 %v752_v8  ;;  %704 = vmatprep.subr.bf16.mxu0 %v755_v11 }
  0x65   :  { %724 = vmatprep.subr.bf16.mxu1 %v754_v10 }
  0x67   :  { %705 = vmatpush3.bf16.msra.mxu0 %v755_v11 }
  0x68   :  { %725 = vmatpush3.bf16.msra.mxu1 %v754_v10  ;;  %706 = vmatprep.subr.bf16.mxu0 %v757_v13 }
  0x69   :  { %726 = vmatprep.subr.bf16.mxu1 %v756_v12 }
  0x6b   :  { %707 = vmatpush3.bf16.msra.mxu0 %v757_v13 }
  0x6c   :  { %727 = vmatpush3.bf16.msra.mxu1 %v756_v12  ;;  %708 = vmatprep.subr.bf16.mxu0 %v759_v18 }
  0x6d   :  { %728 = vmatprep.subr.bf16.mxu1 %v758_v16 }
  0x6f   :  { %709 = vmatpush3.bf16.msra.mxu0 %v759_v18 }
  0x70   :  { %729 = vmatpush3.bf16.msra.mxu1 %v758_v16  ;;  %710 = vmatprep.subr.bf16.mxu0 %v761_v20 }
  0x71   :  { %730 = vmatprep.subr.bf16.mxu1 %v760_v19 }
  0x73   :  { %711 = vmatpush3.bf16.msra.mxu0 %v761_v20 }
  0x74   :  { %731 = vmatpush3.bf16.msra.mxu1 %v760_v19 }
  0x76   :  { %713 = vmatmul.mubr.bf16.vlgmr.msra.gmra.mxu0 %v764_v21 }
  0x77   :  { %733 = vmatmul.mubr.bf16.vlgmr.msra.gmra.mxu1 %v765_v22 }
  0xb8   :  { %v245_v23 = vpop.permute.xlu0 %244 }
 0x116   :  { %v674_v24 = vpop.f32.mrf.mxu0 }
 0x117   :  { %v694_v25 = vpop.f32.mrf.mxu1  ;;  %v249_v26 = vmul.f32 %v674_v24, %v245_v23 }
 0x118   :  { %v223_v27 = vpop.f32.mrf.mxu0 }
 0x119   :  { %v247_v28 = vmul.f32 %v245_v23, %v223_v27  ;;  %v345_v29 = vpop.f32.mrf.mxu1  ;;  %v354_v31 = vadd.f32 %v694_v25, %v249_v26 }
 0x11a   :  { %v675_v30 = vpop.f32.mrf.mxu0 }
 0x11b   :  { %v250_v32 = vmul.f32 %v675_v30, %v245_v23  ;;  %v695_v33 = vpop.f32.mrf.mxu1  ;;  %v346_v36 = vadd.f32 %v345_v29, %v247_v28  ;;  %v369_v40 = vadd.f32 %v576_v34, %v354_v31 }
 0x11c   :  { %v226_v35 = vpop.f32.mrf.mxu0 }
 0x11d   :  { %v357_v37 = vadd.f32 %v695_v33, %v250_v32  ;;  %v248_v38 = vmul.f32 %v245_v23, %v226_v35  ;;  %v348_v39 = vpop.f32.mrf.mxu1  ;;  %v367_v43 = vadd.f32 %v576_v34, %v346_v36 }
 0x11f   :  { %v370_v41 = vadd.f32 %v576_v34, %v357_v37  ;;  %v349_v42 = vadd.f32 %v348_v39, %v248_v38 }
 0x121   :  { %v602_v44 = vpack.c.bf16 %v370_v41, %v369_v40  ;;  %v368_v45 = vadd.f32 %v576_v34, %v349_v42 }
 0x123   :  { %614 = vst [vmem:[#allocation11 + $0x8] sm:$0xff] %v602_v44   ;;  %v597_v46 = vpack.c.bf16 %v368_v45, %v367_v43 }
 0x125   :  { %598 = vst [vmem:[#allocation11] sm:$0xff] %v597_v46  }
 0x126   :  { %857 = shalt.err (!%p854_p10)
}
 0x127   :  { %531 = dma.vmem_to_hbm [thread:$0]  %s526_s27, 256, %s1008_s7, [#allocation5], %s898_s0, %s898_s0, %s899_s12  }
 0x128   :  { %v577_v53 = vld [vmem:[%s1007_s6] ss:$0 sm:$0xff]  ;;  %s904_s10 = smov [#allocation12]  }
 0x129   :  { %s537_s7 = sshll.u32 %s904_s10, 4  ;;  %s538_s7 = int_to_ptr.vmem [resolvable:$true] %s537_s7 }
 0x12a   :  { %s866_s11 = scalar_lea.vmem %s538_s7, 256  ;;  %p871_p12 = scmp.lt.s32.totalorder %s538_s7, %s538_s7 }
 0x12b   :  { %p867_p11 = scmp.ne.s32.totalorder %s538_s7, %s866_s11  ;;  %p872_p13 = scmp.lt.s32.totalorder %s866_s11, %s866_s11 }
 0x12d   :  { %p873_p0 = por %p872_p13, %p871_p12 }
 0x12f   :  { %p874_p1 = pnand %p873_p0, %p867_p11 }
 0x136   :  { %v714_v47 = vpop.f32.mrf.mxu0 }
 0x137   :  { %v734_v48 = vpop.f32.mrf.mxu1 }
 0x138   :  { %v405_v49 = vpop.f32.mrf.mxu0  ;;  %v463_v51 = vadd.f32 %v734_v48, %v714_v47 }
 0x139   :  { %v454_v50 = vpop.f32.mrf.mxu1 }
 0x13a   :  { %v715_v52 = vpop.f32.mrf.mxu0  ;;  %v455_v55 = vadd.f32 %v454_v50, %v405_v49  ;;  %v478_v59 = vadd.f32 %v577_v53, %v463_v51 }
 0x13b   :  { %v735_v54 = vpop.f32.mrf.mxu1 }
 0x13c   :  { %v466_v56 = vadd.f32 %v735_v54, %v715_v52  ;;  %v408_v57 = vpop.f32.mrf.mxu0  ;;  %v476_v62 = vadd.f32 %v577_v53, %v455_v55 }
 0x13d   :  { %v457_v58 = vpop.f32.mrf.mxu1 }
 0x13e   :  { %v479_v60 = vadd.f32 %v577_v53, %v466_v56  ;;  %v458_v61 = vadd.f32 %v457_v58, %v408_v57 }
 0x140   :  { %v612_v63 = vpack.c.bf16 %v479_v60, %v478_v59  ;;  %v477_v0 = vadd.f32 %v577_v53, %v458_v61 }
 0x142   :  { %615 = vst [vmem:[#allocation12 + $0x8] sm:$0xff] %v612_v63   ;;  %v607_v1 = vpack.c.bf16 %v477_v0, %v476_v62 }
 0x144   :  { %608 = vst [vmem:[#allocation12] sm:$0xff] %v607_v1  }
 0x145   :  { %877 = shalt.err (!%p874_p1)
}
 0x146   :  { %543 = dma.vmem_to_hbm [thread:$0]  %s538_s7, 256, %s1009_s8, [#allocation13], %s898_s0, %s898_s0, %s899_s12  }
 0x147   :  { %892 = dma.done.wait [#allocation5], 256  }
 0x148   :  { %893 = vsyncadd [#allocation5], 4294967040 }
 0x149   :  { %894 = dma.done.wait [#allocation13], 256  }
 0x14a   :  { %895 = vsyncadd [#allocation13], 4294967040 }
 0x14b   :  { %550 = vsyncpa [#allocation4], 1 }
 0x14c   :  { %551 = vsyncpa [#allocation7], 1 }
 0x14d   :  { %552 = vsyncpa [#allocation10], 1 }
 0x14e   :  { %553 = vsyncpa [#allocation5], 1 }
 0x14f   :  { %554 = vsyncpa [#allocation13], 1 }

</bundles_post_ra>
